<compile_context>
chip_gen: v6e
topology: v6e:2x2x1
jax: 0.10.0
libtpu: 0.0.40
codegen_flags: <defaults>
</compile_context>

<pallas_src>
import functools

import jax
import jax.numpy as jnp
from jax.experimental import pallas as pl
from jax.experimental.pallas import tpu as pltpu


def _round_up(n, m):
    return ((n + m - 1) // m) * m


def _cdiv(a, b):
    return (a + b - 1) // b


def _nmse_block_kernel(xhat_ref, x_ref, out_ref, *, batch, block_rows):
    # xhat_ref, x_ref: (block_rows, D) lane-dense VMEM tiles (last block may be
    # ragged -> out-of-bounds rows hold unspecified data and are masked below).
    # out_ref: (1, 1, 128) per-block partial-sum slab (lane-dense store).
    b = pl.program_id(0)

    x = x_ref[...].astype(jnp.float32)
    xh = xhat_ref[...].astype(jnp.float32)

    xc = x - 0.5
    power = jnp.sum(xc * xc, axis=-1, keepdims=True)      # (TB, 1)
    d = x - xh                                            # -0.5 cancels in MSE
    mse = jnp.sum(d * d, axis=-1, keepdims=True)          # (TB, 1)

    # Mask rows beyond the real batch (ragged last block). Must be a select
    # (jnp.where), not a multiply-by-mask, so garbage NaN/Inf cannot propagate.
    row = jax.lax.broadcasted_iota(jnp.int32, (block_rows, 1), 0) + b * block_rows
    valid = row < batch
    power_safe = jnp.where(valid, power, 1.0)
    nmse = jnp.where(valid, mse / power_safe, 0.0)

    partial = jnp.sum(nmse)                                # f32 scalar
    out_ref[...] = jnp.full((1, 1, 128), partial, dtype=out_ref.dtype)


def nmse_loss(x_hat, x, reduction="sum", block_rows=None):
    """x_hat, x: (B, 2, H, W) float arrays. Returns scalar NMSE loss."""
    assert reduction in ("sum", "mean"), f"unsupported reduction: {reduction}"
    assert x_hat.shape == x.shape and x.ndim == 4 and x.shape[1] == 2
    B, C, H, W = x.shape
    D = C * H * W
    elt = jnp.dtype(x.dtype).itemsize

    # Lane-dense flatten: a free view of contiguous NCHW. Keep the input dtype
    # (e.g. bf16) for the DMA; the kernel upcasts to f32 for accumulation.
    x2 = x.reshape(B, D)
    xh2 = x_hat.reshape(B, D)

    # Sublane packing per dtype: 8 rows (f32), 16 (bf16/f16), 32 (int8/fp8).
    sub = max(8, 32 // max(elt, 1))

    if block_rows is None:
        # ~2 MiB per input block: 2 inputs x 2 pipeline buffers = 8 MiB VMEM,
        # safe on v5e (16 MiB scoped default) and v7x (64 MiB physical), and
        # large enough to amortize the ~0.35us per-grid-step overhead.
        target_bytes = 2 << 20
        tb = max(sub, ((target_bytes // max(D * elt, 1)) // sub) * sub)
        block_rows = int(min(tb, _round_up(B, sub)))
        # Ensure >= 2 grid steps when the batch allows it so v7x's two
        # TensorCores both stream HBM; costs one extra step on 1-TC chips.
        if B > sub:
            block_rows = min(block_rows, _round_up(_cdiv(B, 2), sub))
    block_rows = max(sub, _round_up(int(block_rows), sub))
    # NOTE: for extremely large D a minimum-row block may still exceed VMEM on
    # v7x; that would need a second ('arbitrary') grid axis tiling D. Not
    # required for CSI-sized inputs handled by this module.

    # No jnp.pad: ragged last block handled by the in-kernel row mask.
    num_blocks = _cdiv(B, block_rows)

    block_bytes = block_rows * D * elt
    # 2 inputs x 2 pipeline buffers + output slabs + internal scratch headroom.
    vmem_limit = int(min(max(4 * block_bytes + (4 << 20), 16 << 20), 64 << 20))

    kernel = functools.partial(
        _nmse_block_kernel, batch=B, block_rows=block_rows
    )

    partials = pl.pallas_call(
        kernel,
        out_shape=jax.ShapeDtypeStruct((num_blocks, 1, 128), jnp.float32),
        grid_spec=pltpu.PrefetchScalarGridSpec(
            num_scalar_prefetch=0,
            grid=(num_blocks,),
            in_specs=[
                pl.BlockSpec((block_rows, D), lambda b: (b, 0)),
                pl.BlockSpec((block_rows, D), lambda b: (b, 0)),
            ],
            out_specs=pl.BlockSpec((1, 1, 128), lambda b: (b, 0, 0)),
        ),
        compiler_params=pltpu.CompilerParams(
            dimension_semantics=("parallel",),  # independent per-block partials
            vmem_limit_bytes=vmem_limit,
        ),
        cost_estimate=pl.CostEstimate(
            flops=6 * B * D,
            transcendentals=0,
            bytes_accessed=2 * B * D * elt + num_blocks * 128 * 4,
        ),
    )(xh2, x2)

    loss = jnp.sum(partials[:, 0, 0])
    if reduction == "mean":
        loss = loss / B
    return loss


if __name__ == "__main__":
    key = jax.random.PRNGKey(0)

    def ref_nmse(x, x_hat, reduction):
        # pure-JAX reference mirroring NMSE_cuda + NMSELoss reduction
        b = x.shape[0]
        xr = x[:, 0].reshape(b, -1) - 0.5
        xi = x[:, 1].reshape(b, -1) - 0.5
        hr = x_hat[:, 0].reshape(b, -1) - 0.5
        hi = x_hat[:, 1].reshape(b, -1) - 0.5
        power = jnp.sum(xr**2 + xi**2, axis=1)
        mse = jnp.sum((xr - hr) ** 2 + (xi - hi) ** 2, axis=1)
        nmse = mse / power
        return jnp.mean(nmse) if reduction == "mean" else jnp.sum(nmse)

    # Case 1: tiny batch (single ragged block, rows 2..7 masked).
    k1, k2 = jax.random.split(key)
    B, C, H, W = 2, 2, 16, 16
    x = jax.random.uniform(k1, (B, C, H, W), dtype=jnp.float32)
    x_hat = jax.random.uniform(k2, (B, C, H, W), dtype=jnp.float32)

    loss = jax.block_until_ready(nmse_loss(x_hat, x, reduction="sum"))
    ref = ref_nmse(x, x_hat, "sum")
    assert jnp.allclose(loss, ref, rtol=1e-5, atol=1e-6), (loss, ref)

    loss_mean = jax.block_until_ready(nmse_loss(x_hat, x, reduction="mean"))
    ref_mean = ref_nmse(x, x_hat, "mean")
    assert jnp.allclose(loss_mean, ref_mean, rtol=1e-5, atol=1e-6), (loss_mean, ref_mean)

    # Case 2: batch not a multiple of the block -> exercises the no-pad ragged
    # last block and the >= 2 parallel blocks (megacore) split.
    k3, k4 = jax.random.split(k2)
    B2 = 10
    x2 = jax.random.uniform(k3, (B2, C, H, W), dtype=jnp.float32)
    x_hat2 = jax.random.uniform(k4, (B2, C, H, W), dtype=jnp.float32)
    loss2 = jax.block_until_ready(nmse_loss(x_hat2, x2, reduction="sum"))
    ref2 = ref_nmse(x2, x_hat2, "sum")
    assert jnp.allclose(loss2, ref2, rtol=1e-5, atol=1e-6), (loss2, ref2)

    print("KERNEL_OK")
</pallas_src>

<mosaic_0001>
module attributes {stable_mosaic.version = 11 : i64} {
  func.func @_nmse_block_kernel(%arg0: i32, %arg1: memref<8x512xf32, #tpu.memory_space<vmem>>, %arg2: memref<8x512xf32, #tpu.memory_space<vmem>>, %arg3: memref<1x1x128xf32, #tpu.memory_space<vmem>>) attributes {dimension_semantics = [#tpu.dimension_semantics<parallel>], iteration_bounds = array<i64: 1>, scalar_prefetch = 0 : i64, scratch_operands = 0 : i64, tpu.core_type = #tpu.core_type<tc>, window_params = [{transform_indices = @transform_0, window_bounds = array<i64: 8, 512>}, {transform_indices = @transform_1, window_bounds = array<i64: 8, 512>}, {transform_indices = @transform_2, window_bounds = array<i64: 1, 1, 128>}]} {
    %c0 = arith.constant 0 : index
    %c0_0 = arith.constant 0 : index
    %0 = vector.load %arg2[%c0, %c0_0] : memref<8x512xf32, #tpu.memory_space<vmem>>, vector<8x512xf32>
    %c0_1 = arith.constant 0 : index
    %c0_2 = arith.constant 0 : index
    %1 = vector.load %arg1[%c0_1, %c0_2] : memref<8x512xf32, #tpu.memory_space<vmem>>, vector<8x512xf32>
    %cst = arith.constant 5.000000e-01 : f32
    %2 = vector.broadcast %cst : f32 to vector<8x512xf32>
    %3 = arith.subf %0, %2 : vector<8x512xf32>
    %4 = arith.mulf %3, %3 : vector<8x512xf32>
    %cst_3 = arith.constant dense<0.000000e+00> : vector<8xf32>
    %5 = vector.multi_reduction <add>, %4, %cst_3 [1] : vector<8x512xf32> to vector<8xf32>
    %6 = vector.shape_cast %5 : vector<8xf32> to vector<8x1xf32>
    %7 = arith.subf %0, %1 : vector<8x512xf32>
    %8 = arith.mulf %7, %7 : vector<8x512xf32>
    %cst_4 = arith.constant dense<0.000000e+00> : vector<8xf32>
    %9 = vector.multi_reduction <add>, %8, %cst_4 [1] : vector<8x512xf32> to vector<8xf32>
    %10 = vector.shape_cast %9 : vector<8xf32> to vector<8x1xf32>
    %11 = tpu.iota {dimensions = array<i32: 0>} : vector<8x1xi32>
    %c8_i32 = arith.constant 8 : i32
    %12 = arith.muli %arg0, %c8_i32 : i32
    %13 = vector.broadcast %12 : i32 to vector<8x1xi32>
    %14 = arith.addi %11, %13 : vector<8x1xi32>
    %c2_i32 = arith.constant 2 : i32
    %15 = vector.broadcast %c2_i32 : i32 to vector<8x1xi32>
    %16 = arith.cmpi slt, %14, %15 : vector<8x1xi32>
    %cst_5 = arith.constant 1.000000e+00 : f32
    %17 = vector.broadcast %cst_5 : f32 to vector<8x1xf32>
    %18 = arith.select %16, %6, %17 : vector<8x1xi1>, vector<8x1xf32>
    %19 = arith.divf %10, %18 : vector<8x1xf32>
    %cst_6 = arith.constant 0.000000e+00 : f32
    %20 = vector.broadcast %cst_6 : f32 to vector<8x1xf32>
    %21 = arith.select %16, %19, %20 : vector<8x1xi1>, vector<8x1xf32>
    %22 = vector.shape_cast %21 : vector<8x1xf32> to vector<1x8x1xf32>
    %cst_7 = arith.constant dense<0.000000e+00> : vector<1xf32>
    %23 = vector.multi_reduction <add>, %22, %cst_7 [1, 2] : vector<1x8x1xf32> to vector<1xf32>
    %24 = vector.shape_cast %23 : vector<1xf32> to vector<1x1x1xf32>
    %25 = vector.extract %24[0, 0, 0] : f32 from vector<1x1x1xf32>
    %26 = vector.broadcast %25 : f32 to vector<1x1x128xf32>
    %c0_8 = arith.constant 0 : index
    %c0_9 = arith.constant 0 : index
    %c0_10 = arith.constant 0 : index
    %27 = vector.load %arg3[%c0_8, %c0_9, %c0_10] : memref<1x1x128xf32, #tpu.memory_space<vmem>>, vector<1x1x128xf32>
    tpu.vector_store %arg3[%c0_8, %c0_9, %c0_10], %26 {strides = array<i32>} : memref<1x1x128xf32, #tpu.memory_space<vmem>>, vector<1x1x128xf32>,
    return
  }
  func.func @transform_0(%arg0: i32) -> (i32, i32) {
    %c0_i32 = arith.constant 0 : i32
    %c0_i32_0 = arith.constant 0 : i32
    return %arg0, %c0_i32 : i32, i32
  }
  func.func @transform_1(%arg0: i32) -> (i32, i32) {
    %c0_i32 = arith.constant 0 : i32
    %c0_i32_0 = arith.constant 0 : i32
    return %arg0, %c0_i32 : i32, i32
  }
  func.func @transform_2(%arg0: i32) -> (i32, i32, i32) {
    %c0_i32 = arith.constant 0 : i32
    %c0_i32_0 = arith.constant 0 : i32
    %c0_i32_1 = arith.constant 0 : i32
    return %arg0, %c0_i32, %c0_i32_0 : i32, i32, i32
  }
}

</mosaic_0001>

<bundles_post_ra>
// kernel: tpu_custom_call.1
= control target key start
LH: loop header
LB: loop body
LE: loop exit
PB: predicated region body
PF: predicated region fallthrough
CT: control target
= control target key end

     0   :  { %7 = vsyncpa [#allocation3], 0  ;;  %s315_s0 = inlined_call_operand.hbm [shape: f32[2,512], index: 0, kind: input, shape index: {}]   ;;  %s316_s1 = inlined_call_operand.hbm [shape: f32[2,512], index: 1, kind: input, shape index: {}]   ;;  %s317_s2 = inlined_call_operand.hbm [shape: f32[1,1,128], index: 2, kind: output, shape index: {}]  }
   0x1   :  { %8 = vsyncpa [#allocation6], 0 }
   0x2   :  { %9 = vsyncpa [#allocation4], 0 }
   0x3   :  { %14 = vsyncadd [#allocation3], 384  ;;  %s281_s9 = smov [#allocation2]  }
   0x4   :  { %s15_s10 = sshll.u32 %s281_s9, 4  ;;  %s16_s10 = int_to_ptr.vmem [resolvable:$true] %s15_s10 }
   0x5   :  { %s223_s11 = scalar_lea.vmem %s16_s10, 128  ;;  %s227_s12 = scalar_lea.vmem %s16_s10, 512 }
   0x6   :  { %p224_p0 = scmp.ne.s32.totalorder %s16_s10, %s223_s11  ;;  %p228_p1 = scmp.lt.s32.totalorder %s16_s10, %s16_s10 }
   0x7   :  { %p229_p2 = scmp.lt.s32.totalorder %s227_s12, %s223_s11 }
   0x9   :  { %p230_p3 = por %p229_p2, %p228_p1 }
   0xb   :  { %p231_p4 = pnand %p230_p3, %p224_p0 }
   0xd   :  { %234 = shalt.err (!%p231_p4)
}
   0xe   :  { %s282_s13 = smov 128   ;;  %s283_s14 = smov 8  }
   0xf   :  { %21 = dma.hbm_to_vmem [thread:$0]  %s315_s0, 128, %s16_s10, [#allocation3], %s282_s13, %s282_s13, %s283_s14  }
  0x10   :  { %26 = vsyncadd [#allocation6], 384  ;;  %s284_s17 = smov [#allocation5]  }
  0x11   :  { %s27_s18 = sshll.u32 %s284_s17, 4  ;;  %s28_s18 = int_to_ptr.vmem [resolvable:$true] %s27_s18 }
  0x12   :  { %s243_s19 = scalar_lea.vmem %s28_s18, 128  ;;  %s247_s20 = scalar_lea.vmem %s28_s18, 512 }
  0x13   :  { %p244_p5 = scmp.ne.s32.totalorder %s28_s18, %s243_s19  ;;  %p248_p6 = scmp.lt.s32.totalorder %s28_s18, %s28_s18 }
  0x14   :  { %p249_p7 = scmp.lt.s32.totalorder %s247_s20, %s243_s19 }
  0x16   :  { %p250_p8 = por %p249_p7, %p248_p6 }
  0x18   :  { %p251_p9 = pnand %p250_p8, %p244_p5 }
  0x1a   :  { %254 = shalt.err (!%p251_p9)
}
  0x1b   :  { %33 = dma.hbm_to_vmem [thread:$0]  %s316_s1, 128, %s28_s18, [#allocation6], %s282_s13, %s282_s13, %s283_s14  }
  0x1c   :  { %275 = dma.done.wait [#allocation3], 512  }
  0x1d   :  { %276 = vsyncadd [#allocation3], 4294966784 }
  0x1e   :  { %277 = dma.done.wait [#allocation6], 512  }
  0x1f   :  { %278 = vsyncadd [#allocation6], 4294966784  ;;  %v285_v0 = vmov 1983009808   ;;  %v67_v2 = vlaneseq  ;;  %v40_v5 = vld [vmem:[#allocation5] sm:$0xff]  ;;  %v41_v6 = vld [vmem:[#allocation5 + $0x8] sm:$0xff] }
  0x20   :  { %v65_v1 = vunpack.c.l.s4 %v285_v0  ;;  %v42_v7 = vld [vmem:[#allocation5 + $0x10] sm:$0xff]  ;;  %v43_v8 = vld [vmem:[#allocation5 + $0x18] sm:$0xff]  ;;  %v201_v9 = vadd.f32 -0.5, %v40_v5  ;;  %v202_v10 = vadd.f32 -0.5, %v41_v6  ;;  %v44_v12 = vld [vmem:[#allocation2] sm:$0xff]  ;;  %vm172_vm1 = vcmask 7168  }
  0x21   :  { %v308_v4 = vshrl.u32 %v67_v2, 7  ;;  %v203_v11 = vadd.f32 -0.5, %v42_v7  ;;  %v45_v13 = vld [vmem:[#allocation2 + $0x8] sm:$0xff]  ;;  %v204_v14 = vadd.f32 -0.5, %v43_v8  ;;  %v46_v16 = vld [vmem:[#allocation2 + $0x10] sm:$0xff]  ;;  %v47_v17 = vld [vmem:[#allocation2 + $0x18] sm:$0xff]  ;;  %v105_v18 = vsub.f32 %v40_v5, %v44_v12 }
  0x22   :  { %v66_v3 = vunpack.c.0.s8 %v65_v1  ;;  %v106_v19 = vsub.f32 %v41_v6, %v45_v13  ;;  %v52_v20 = vmul.f32 %v201_v9, %v201_v9  ;;  %v53_v21 = vmul.f32 %v202_v10, %v202_v10  ;;  %s286_s0 = smov [#allocation7]  }
  0x23   :  { %v54_v22 = vmul.f32 %v203_v11, %v203_v11  ;;  %v107_v23 = vsub.f32 %v42_v7, %v46_v16  ;;  %v55_v24 = vmul.f32 %v204_v14, %v204_v14  ;;  %v108_v25 = vsub.f32 %v43_v8, %v47_v17  ;;  %s191_s1 = sshll.u32 %s286_s0, 4  ;;  %s192_s1 = int_to_ptr.vmem [resolvable:$true] %s191_s1 }
  0x24   :  { %v69_v15 = vsub.s32 %v66_v3, %v308_v4  ;;  %v109_v26 = vmul.f32 %v105_v18, %v105_v18  ;;  %v110_v27 = vmul.f32 %v106_v19, %v106_v19  ;;  %v60_v28 = vcombine.low %v52_v20, %v53_v21  ;;  %s255_s24 = scalar_lea.vmem %s192_s1, 16  ;;  %s259_s25 = scalar_lea.vmem %s192_s1, 32 }
  0x25   :  { %v61_v29 = vcombine.high %v52_v20, %v53_v21  ;;  %v111_v30 = vmul.f32 %v107_v23, %v107_v23  ;;  %v62_v31 = vcombine.low %v54_v22, %v55_v24  ;;  %v63_v32 = vcombine.high %v54_v22, %v55_v24  ;;  %p256_p10 = scmp.ne.s32.totalorder %s192_s1, %s255_s24  ;;  %p260_p11 = scmp.lt.s32.totalorder %s192_s1, %s192_s1 }
  0x26   :  { %v112_v33 = vmul.f32 %v108_v25, %v108_v25  ;;  %v117_v34 = vcombine.low %v109_v26, %v110_v27  ;;  %v70_v35 = vrot.slane %v60_v28, %v69_v15  ;;  %v118_v37 = vcombine.high %v109_v26, %v110_v27  ;;  %p261_p12 = scmp.lt.s32.totalorder %s259_s25, %s255_s24 }
  0x27   :  { %v77_v36 = vrot.slane %v61_v29, %v69_v15  ;;  %v84_v38 = vrot.slane %v62_v31, %v69_v15  ;;  %v91_v39 = vrot.slane %v63_v32, %v69_v15  ;;  %vm167_vm0 = vcmp.lt.s32.totalorder %v308_v4, 2 }
  0x28   :  { %v119_v40 = vcombine.low %v111_v30, %v112_v33  ;;  %v120_v41 = vcombine.high %v111_v30, %v112_v33  ;;  %v127_v42 = vrot.slane %v117_v34, %v69_v15  ;;  %v134_v43 = vrot.slane %v118_v37, %v69_v15  ;;  %p262_p13 = por %p261_p12, %p260_p11 }
  0x29   :  { %v92_v44 = vcombine.low %v70_v35, %v84_v38  ;;  %v93_v45 = vcombine.high %v70_v35, %v84_v38  ;;  %v94_v46 = vcombine.low %v77_v36, %v91_v39  ;;  %v95_v49 = vcombine.high %v77_v36, %v91_v39 }
  0x2a   :  { %v141_v47 = vrot.slane %v119_v40, %v69_v15  ;;  %v148_v48 = vrot.slane %v120_v41, %v69_v15  ;;  %p263_p0 = pnand %p262_p13, %p256_p10 }
  0x2b   :  { %v100_v50 = vadd.f32 %v93_v45, %v92_v44 }
  0x2c   :  { %v149_v51 = vcombine.low %v127_v42, %v141_v47  ;;  %v150_v52 = vcombine.high %v127_v42, %v141_v47  ;;  %v151_v53 = vcombine.low %v134_v43, %v148_v48  ;;  %v152_v55 = vcombine.high %v134_v43, %v148_v48 }
  0x2d   :  { %v101_v54 = vadd.f32 %v100_v50, %v94_v46 }
  0x2e   :  { %v157_v56 = vadd.f32 %v150_v52, %v149_v51 }
  0x2f   :  { %v102_v57 = vadd.f32 %v101_v54, %v95_v49 }
  0x30   :  { %v158_v58 = vadd.f32 %v157_v56, %v151_v53 }
  0x31   :  { %103 = vadd.xlane.f32.xlu0 %v102_v57 }
  0x32   :  { %v159_v59 = vadd.f32 %v158_v58, %v152_v55 }
  0x35   :  { %160 = vadd.xlane.f32.xlu0 %v159_v59 }
  0xba   :  { %v104_v60 = vpop.xlane.xlu0 %103 }
  0xbb   :  { %v168_v61 = vsel %vm167_vm0, %v104_v60, 1.0 }
  0xbc   :  { %213 = vrcp.f32 %v168_v61 }
  0xbe   :  { %v161_v62 = vpop.xlane.xlu0 %160 }
  0xc9   :  { %v214_v63 = vpop.eup %213 }
  0xca   :  { %v170_v0 = vmul.f32 %v214_v63, %v161_v62 }
  0xcc   :  { %v171_v1 = vsel %vm167_vm0, %v170_v0, 0.0 }
  0xcd   :  { %v173_v2 = vsel %vm172_vm1, %v171_v1, 0.0 }
  0xce   :  { %174 = vadd.xlane.f32.xlu1 %v173_v2 }
 0x157   :  { %v175_v3 = vpop.xlane.xlu1 %174 }
 0x158   :  { %v176_v5 = vrot.slane %v175_v3, 4 }
 0x15a   :  { %v177_v6 = vadd.f32 %v176_v5, %v175_v3 }
 0x15c   :  { %v178_v7 = vrot.slane %v177_v6, 2 }
 0x15e   :  { %v179_v8 = vadd.f32 %v178_v7, %v177_v6 }
 0x160   :  { %v180_v9 = vrot.slane %v179_v8, 1 }
 0x162   :  { %v181_v10 = vadd.f32 %v180_v9, %v179_v8 }
 0x164   :  { %205 = vpush %v181_v10 }
 0x195   :  { %s206_s23 = spop %205 }
 0x196   :  { %v183_v4 = vstv %s206_s23 }
 0x197   :  { %184 = vst [vmem:[#allocation7] sm:$0x1] %v183_v4 }
 0x198   :  { %266 = shalt.err (!%p263_p0)
}
 0x199   :  { %194 = dma.vmem_to_hbm [thread:$0]  %s192_s1, 16, %s317_s2, [#allocation4]  }
 0x19a   :  { %279 = dma.done.wait [#allocation4], 16  }
 0x19b   :  { %280 = vsyncadd [#allocation4], 4294967280 }
 0x19c   :  { %198 = vsyncpa [#allocation3], 1 }
 0x19d   :  { %199 = vsyncpa [#allocation6], 1 }
 0x19e   :  { %200 = vsyncpa [#allocation4], 1 }

</bundles_post_ra>
